<compile_context>
chip_gen: v7x
topology: tpu7x:2x2x1
jax: 0.10.0
libtpu: 0.0.40
codegen_flags: <defaults>
</compile_context>

<pallas_src>
import functools

import jax
import jax.numpy as jnp
from jax.experimental import pallas as pl
from jax.experimental.pallas import tpu as pltpu

# ----------------------------- config (synthetic) -----------------------------
CONFIG = dict(
    in_fdim=32,
    out_fdim=32,
    inter_fdim=32,          # "feature_space"
    upsampling_rate=4,
    kernel_radius=0.5,
    estimate_radius=False,
    use_batch_norm=False,
)

NEG_SLOPE = 0.01  # nn.LeakyReLU default


def _leaky(x):
    return jnp.where(x > 0, x, NEG_SLOPE * x)


def _cdiv(a, b):
    return -(-a // b)


def _round_up(x, m):
    return ((x + m - 1) // m) * m


def _choose_tile_n(n, max_tile, min_steps):
    """Rows per grid step: >= min_steps steps total, <= max_tile rows/step."""
    steps = max(min_steps, _cdiv(n, max_tile))
    t = _round_up(max(_cdiv(n, steps), 1), 8)
    return max(8, min(t, _round_up(max_tile, 8)))


# --------------------------------- kernel -------------------------------------
def _linear_deconv_kernel(kernel_radius, n_f_cols, up, matmul_dtype,
                          f_ref, p_ref,
                          w1_ref, b1_ref, w2_ref, b2_ref,
                          f_out_ref, p_out_ref):
    # f_ref     : [tN, in_fdim]            (matmul_dtype)
    # p_ref     : [tN, 3]                  (f32)
    # w1_ref    : [in_fdim, 2*hid]         fused [feature | transl] layer 1
    # b1_ref    : [1, 2*hid]               (f32)
    # w2_ref    : [2*hid, n_f_cols + 3*U]  block-diagonal fused layer 2
    # b2_ref    : [1, n_f_cols + 3*U]      (f32)
    # f_out_ref : [tN, n_f_cols]           feature output (bf16 on default path)
    # p_out_ref : [tN, 3*U]                position output (f32)
    f = f_ref[...]

    # fused first layer (both branches in one MXU pass, f32 accumulation)
    h = jnp.dot(f, w1_ref[...], preferred_element_type=jnp.float32) + b1_ref[...]
    h = _leaky(h)                                            # f32 elementwise

    # fused block-diagonal second layer (single MXU pass)
    z = jnp.dot(h.astype(matmul_dtype), w2_ref[...],
                preferred_element_type=jnp.float32) + b2_ref[...]

    # feature branch: lanes [0, n_f_cols) -> LeakyReLU, lane-dense store
    f_out_ref[...] = _leaky(z[:, :n_f_cols]).astype(f_out_ref.dtype)

    # translation branch: tanh * kr + p (p replicated in-kernel on the XLU)
    p_rep = jnp.tile(p_ref[...], (1, up))                    # [tN, 3*U]
    d = jnp.tanh(z[:, n_f_cols:]) * kernel_radius + p_rep
    p_out_ref[...] = d.astype(p_out_ref.dtype)


# --------------------------------- wrapper -------------------------------------
def linear_deconv(p, f, params, config, *, max_tile_n=1024, min_grid_steps=8,
                  matmul_dtype=jnp.bfloat16, f_out_dtype=None):
    """p: [N, 3] f32, f: [N, in_fdim] f32 -> (p_new [N*U, 3] f32, f_new [N*U, out_fdim])."""
    N, in_fdim = f.shape
    up = config['upsampling_rate']
    out_fdim = config['out_fdim']
    hid = config['inter_fdim']
    kr = float(config['kernel_radius'])
    if f_out_dtype is None:
        f_out_dtype = matmul_dtype

    n_f_cols = out_fdim * up        # 128 with the default config (lane-dense)
    n_p_cols = 3 * up               # 12
    n_out = n_f_cols + n_p_cols     # 140
    # NOTE: if out_fdim*up is ever not a multiple of 128, the z split point /
    # feature store become masked (correct, slower); pad packed columns to 128
    # in that case.

    (w1t, b1t, w2t, b2t, w1f, b1f, w2f, b2f) = params

    # ---- parameter packing (wrapper-side glue; constant-folded under jit) ----
    # fused first layer: [in_fdim, 2*hid] = [w1f | w1t]
    w1 = jnp.concatenate([w1f, w1t], axis=1).astype(matmul_dtype)
    b1 = jnp.concatenate([b1f, b1t], axis=1).astype(jnp.float32)
    # fused block-diagonal second layer: rows 0:hid -> feature cols,
    #                                    rows hid:  -> transl cols
    w2 = jnp.zeros((2 * hid, n_out), jnp.float32)
    w2 = w2.at[:hid, :n_f_cols].set(w2f)
    w2 = w2.at[hid:, n_f_cols:].set(w2t)
    w2 = w2.astype(matmul_dtype)
    b2 = jnp.concatenate([b2f, b2t], axis=1).astype(jnp.float32)

    f_in = f.astype(matmul_dtype)
    p_in = p.astype(jnp.float32)

    # ---- adaptive tiling: ragged N handled by the ceil-div boundary block ----
    tile_n = _choose_tile_n(N, max_tile_n, min_grid_steps)
    grid = (_cdiv(N, tile_n),)

    row_spec = lambda ncols: pl.BlockSpec((tile_n, ncols), lambda i: (i, 0))
    full_spec = lambda r, c: pl.BlockSpec((r, c), lambda i: (0, 0))

    kernel = functools.partial(_linear_deconv_kernel, kr, n_f_cols, up,
                               matmul_dtype)

    f_out, p_out = pl.pallas_call(
        kernel,
        out_shape=(jax.ShapeDtypeStruct((N, n_f_cols), f_out_dtype),
                   jax.ShapeDtypeStruct((N, n_p_cols), jnp.float32)),
        grid_spec=pltpu.PrefetchScalarGridSpec(
            num_scalar_prefetch=0,
            grid=grid,
            in_specs=[
                row_spec(in_fdim),            # f
                row_spec(3),                  # p
                full_spec(in_fdim, 2 * hid),  # w1 fused
                full_spec(1, 2 * hid),        # b1 fused
                full_spec(2 * hid, n_out),    # w2 fused (block-diagonal)
                full_spec(1, n_out),          # b2 fused
            ],
            out_specs=[
                row_spec(n_f_cols),           # f_new slab (lane-dense, bf16)
                row_spec(n_p_cols),           # p_new slab (f32)
            ],
            # NOTE: pipeline_mode=pl.Buffered(3) on the row specs is a candidate
            # sweep at large N; left at the default depth here.
        ),
        compiler_params=pltpu.CompilerParams(
            dimension_semantics=("parallel",)),
    )(f_in, p_in, w1, b1, w2, b2)

    # free row-major views: [N, U*C] -> [N*U, C]
    f_new = f_out.reshape(N * up, out_fdim)
    p_new = p_out.reshape(N * up, 3)
    return p_new, f_new


# ------------------------------ parameter init ---------------------------------
def init_params(key, config):
    in_fdim = config['in_fdim']
    out_fdim = config['out_fdim']
    hid = config['inter_fdim']
    up = config['upsampling_rate']
    ks = jax.random.split(key, 8)

    def lin(kw, kb, fan_in, fan_out):
        bound = 1.0 / jnp.sqrt(fan_in)
        w = jax.random.uniform(kw, (fan_in, fan_out), jnp.float32, -bound, bound)
        b = jax.random.uniform(kb, (1, fan_out), jnp.float32, -bound, bound)
        return w, b

    w1t, b1t = lin(ks[0], ks[1], in_fdim, hid)
    w2t, b2t = lin(ks[2], ks[3], hid, 3 * up)
    w1f, b1f = lin(ks[4], ks[5], in_fdim, hid)
    w2f, b2f = lin(ks[6], ks[7], hid, out_fdim * up)
    return (w1t, b1t, w2t, b2t, w1f, b1f, w2f, b2f)


# --------------------------------- reference ------------------------------------
def linear_deconv_ref(p, f, params, config, matmul_dtype=jnp.float32):
    (w1t, b1t, w2t, b2t, w1f, b1f, w2f, b2f) = params
    up = config['upsampling_rate']
    out_fdim = config['out_fdim']
    kr = float(config['kernel_radius'])

    def mm(x, w):
        return jnp.dot(x.astype(matmul_dtype), w.astype(matmul_dtype),
                       preferred_element_type=jnp.float32)

    ht = _leaky(mm(f, w1t) + b1t)
    d = jnp.tanh(mm(ht, w2t) + b2t)
    d = d.reshape(f.shape[0], up, 3) * kr
    p_new = (p[:, None, :] + d).reshape(f.shape[0] * up, 3)

    hf = _leaky(mm(f, w1f) + b1f)
    g = _leaky(mm(hf, w2f) + b2f)
    f_new = g.reshape(f.shape[0] * up, out_fdim)
    return p_new, f_new


# ----------------------------------- main ---------------------------------------
if __name__ == "__main__":
    key = jax.random.PRNGKey(0)
    kp, kf, kparams = jax.random.split(key, 3)

    up = CONFIG['upsampling_rate']
    N = 300  # deliberately ragged: exercises the ceil-div boundary block
    p = jax.random.normal(kp, (N, 3), jnp.float32)
    f = jax.random.normal(kf, (N, CONFIG['in_fdim']), jnp.float32)
    params = init_params(kparams, CONFIG)

    # --- f32 matmul path: exactness check against pure-f32 reference ---
    p32, f32_ = linear_deconv(p, f, params, CONFIG, matmul_dtype=jnp.float32)
    jax.block_until_ready((p32, f32_))
    p_ref32, f_ref32 = linear_deconv_ref(p, f, params, CONFIG,
                                         matmul_dtype=jnp.float32)
    assert p32.shape == (N * up, 3)
    assert f32_.shape == (N * up, CONFIG['out_fdim'])
    assert jnp.allclose(p32, p_ref32, atol=1e-4, rtol=1e-4)
    assert jnp.allclose(f32_, f_ref32, atol=1e-4, rtol=1e-4)

    # --- default perf path: bf16 matmuls, bf16 f_new, f32 p_new ---
    p_bf, f_bf = linear_deconv(p, f, params, CONFIG)
    jax.block_until_ready((p_bf, f_bf))
    p_refb, f_refb = linear_deconv_ref(p, f, params, CONFIG,
                                       matmul_dtype=jnp.bfloat16)
    assert p_bf.shape == (N * up, 3)
    assert f_bf.shape == (N * up, CONFIG['out_fdim'])
    assert p_bf.dtype == jnp.float32
    assert f_bf.dtype == jnp.bfloat16
    assert jnp.allclose(p_bf, p_refb, atol=1e-2, rtol=1e-2)
    assert jnp.allclose(f_bf.astype(jnp.float32), f_refb, atol=2e-2, rtol=2e-2)

    print("KERNEL_OK")
</pallas_src>

<mosaic_0001>
module attributes {stable_mosaic.version = 11 : i64} {
  func.func @_linear_deconv_kernel(%arg0: i32, %arg1: memref<40x32xf32, #tpu.memory_space<vmem>>, %arg2: memref<40x3xf32, #tpu.memory_space<vmem>>, %arg3: memref<32x64xf32, #tpu.memory_space<vmem>>, %arg4: memref<1x64xf32, #tpu.memory_space<vmem>>, %arg5: memref<64x140xf32, #tpu.memory_space<vmem>>, %arg6: memref<1x140xf32, #tpu.memory_space<vmem>>, %arg7: memref<40x128xf32, #tpu.memory_space<vmem>>, %arg8: memref<40x12xf32, #tpu.memory_space<vmem>>) attributes {dimension_semantics = [#tpu.dimension_semantics<parallel>], iteration_bounds = array<i64: 8>, scalar_prefetch = 0 : i64, scratch_operands = 0 : i64, tpu.core_type = #tpu.core_type<tc>, window_params = [{transform_indices = @transform_0, window_bounds = array<i64: 40, 32>}, {transform_indices = @transform_1, window_bounds = array<i64: 40, 3>}, {pipeline_mode = #tpu.pipeline_mode<synchronous>, transform_indices = @transform_2, window_bounds = array<i64: 32, 64>}, {pipeline_mode = #tpu.pipeline_mode<synchronous>, transform_indices = @transform_3, window_bounds = array<i64: 1, 64>}, {pipeline_mode = #tpu.pipeline_mode<synchronous>, transform_indices = @transform_4, window_bounds = array<i64: 64, 140>}, {pipeline_mode = #tpu.pipeline_mode<synchronous>, transform_indices = @transform_5, window_bounds = array<i64: 1, 140>}, {transform_indices = @transform_6, window_bounds = array<i64: 40, 128>}, {transform_indices = @transform_7, window_bounds = array<i64: 40, 12>}]} {
    %c0 = arith.constant 0 : index
    %c0_0 = arith.constant 0 : index
    %0 = vector.load %arg1[%c0, %c0_0] : memref<40x32xf32, #tpu.memory_space<vmem>>, vector<40x32xf32>
    %c0_1 = arith.constant 0 : index
    %c0_2 = arith.constant 0 : index
    %1 = vector.load %arg3[%c0_1, %c0_2] : memref<32x64xf32, #tpu.memory_space<vmem>>, vector<32x64xf32>
    %cst = arith.constant dense<0.000000e+00> : vector<40x64xf32>
    %2 = tpu.matmul %0, %1, %cst {dimension_numbers = #tpu.dot_dimension_numbers<[1], [0], [0], [1], [0, 0, 1, 1], [], []>} : vector<40x32xf32>, vector<32x64xf32>, vector<40x64xf32> -> vector<40x64xf32>
    %c0_3 = arith.constant 0 : index
    %c0_4 = arith.constant 0 : index
    %3 = vector.load %arg4[%c0_3, %c0_4] : memref<1x64xf32, #tpu.memory_space<vmem>>, vector<1x64xf32>
    %4 = vector.broadcast %3 : vector<1x64xf32> to vector<40x64xf32>
    %5 = arith.addf %2, %4 : vector<40x64xf32>
    %cst_5 = arith.constant 0.000000e+00 : f32
    %6 = vector.broadcast %cst_5 : f32 to vector<40x64xf32>
    %7 = arith.cmpf ogt, %5, %6 : vector<40x64xf32>
    %cst_6 = arith.constant 0.00999999977 : f32
    %8 = vector.broadcast %cst_6 : f32 to vector<40x64xf32>
    %9 = arith.mulf %8, %5 : vector<40x64xf32>
    %10 = arith.select %7, %5, %9 : vector<40x64xi1>, vector<40x64xf32>
    %c0_7 = arith.constant 0 : index
    %c0_8 = arith.constant 0 : index
    %11 = vector.load %arg5[%c0_7, %c0_8] : memref<64x140xf32, #tpu.memory_space<vmem>>, vector<64x140xf32>
    %cst_9 = arith.constant dense<0.000000e+00> : vector<40x140xf32>
    %12 = tpu.matmul %10, %11, %cst_9 {dimension_numbers = #tpu.dot_dimension_numbers<[1], [0], [0], [1], [0, 0, 1, 1], [], []>} : vector<40x64xf32>, vector<64x140xf32>, vector<40x140xf32> -> vector<40x140xf32>
    %c0_10 = arith.constant 0 : index
    %c0_11 = arith.constant 0 : index
    %13 = vector.load %arg6[%c0_10, %c0_11] : memref<1x140xf32, #tpu.memory_space<vmem>>, vector<1x140xf32>
    %14 = vector.broadcast %13 : vector<1x140xf32> to vector<40x140xf32>
    %15 = arith.addf %12, %14 : vector<40x140xf32>
    %16 = vector.extract_strided_slice %15 {offsets = [0, 0], sizes = [40, 128], strides = [1, 1]} : vector<40x140xf32> to vector<40x128xf32>
    %cst_12 = arith.constant 0.000000e+00 : f32
    %17 = vector.broadcast %cst_12 : f32 to vector<40x128xf32>
    %18 = arith.cmpf ogt, %16, %17 : vector<40x128xf32>
    %cst_13 = arith.constant 0.00999999977 : f32
    %19 = vector.broadcast %cst_13 : f32 to vector<40x128xf32>
    %20 = arith.mulf %19, %16 : vector<40x128xf32>
    %21 = arith.select %18, %16, %20 : vector<40x128xi1>, vector<40x128xf32>
    %c0_14 = arith.constant 0 : index
    %c0_15 = arith.constant 0 : index
    %22 = vector.load %arg7[%c0_14, %c0_15] : memref<40x128xf32, #tpu.memory_space<vmem>>, vector<40x128xf32>
    tpu.vector_store %arg7[%c0_14, %c0_15], %21 {strides = array<i32>} : memref<40x128xf32, #tpu.memory_space<vmem>>, vector<40x128xf32>,
    %c0_16 = arith.constant 0 : index
    %c0_17 = arith.constant 0 : index
    %23 = vector.load %arg2[%c0_16, %c0_17] : memref<40x3xf32, #tpu.memory_space<vmem>>, vector<40x3xf32>
    %24 = tpu.concatenate %23, %23, %23, %23 in 1 : vector<40x3xf32>, vector<40x3xf32>, vector<40x3xf32>, vector<40x3xf32> -> vector<40x12xf32>
    %25 = vector.extract_strided_slice %15 {offsets = [0, 128], sizes = [40, 12], strides = [1, 1]} : vector<40x140xf32> to vector<40x12xf32>
    %26 = math.tanh %25 : vector<40x12xf32>
    %cst_18 = arith.constant 5.000000e-01 : f32
    %27 = vector.broadcast %cst_18 : f32 to vector<40x12xf32>
    %28 = arith.mulf %26, %27 : vector<40x12xf32>
    %29 = arith.addf %28, %24 : vector<40x12xf32>
    %c0_19 = arith.constant 0 : index
    %c0_20 = arith.constant 0 : index
    %30 = vector.load %arg8[%c0_19, %c0_20] : memref<40x12xf32, #tpu.memory_space<vmem>>, vector<40x12xf32>
    tpu.vector_store %arg8[%c0_19, %c0_20], %29 {strides = array<i32>} : memref<40x12xf32, #tpu.memory_space<vmem>>, vector<40x12xf32>,
    return
  }
  func.func @transform_0(%arg0: i32) -> (i32, i32) {
    %c0_i32 = arith.constant 0 : i32
    %c0_i32_0 = arith.constant 0 : i32
    return %arg0, %c0_i32 : i32, i32
  }
  func.func @transform_1(%arg0: i32) -> (i32, i32) {
    %c0_i32 = arith.constant 0 : i32
    %c0_i32_0 = arith.constant 0 : i32
    return %arg0, %c0_i32 : i32, i32
  }
  func.func @transform_2(%arg0: i32) -> (i32, i32) {
    %c0_i32 = arith.constant 0 : i32
    %c0_i32_0 = arith.constant 0 : i32
    %c0_i32_1 = arith.constant 0 : i32
    return %c0_i32, %c0_i32_0 : i32, i32
  }
  func.func @transform_3(%arg0: i32) -> (i32, i32) {
    %c0_i32 = arith.constant 0 : i32
    %c0_i32_0 = arith.constant 0 : i32
    %c0_i32_1 = arith.constant 0 : i32
    return %c0_i32, %c0_i32_0 : i32, i32
  }
  func.func @transform_4(%arg0: i32) -> (i32, i32) {
    %c0_i32 = arith.constant 0 : i32
    %c0_i32_0 = arith.constant 0 : i32
    %c0_i32_1 = arith.constant 0 : i32
    return %c0_i32, %c0_i32_0 : i32, i32
  }
  func.func @transform_5(%arg0: i32) -> (i32, i32) {
    %c0_i32 = arith.constant 0 : i32
    %c0_i32_0 = arith.constant 0 : i32
    %c0_i32_1 = arith.constant 0 : i32
    return %c0_i32, %c0_i32_0 : i32, i32
  }
  func.func @transform_6(%arg0: i32) -> (i32, i32) {
    %c0_i32 = arith.constant 0 : i32
    %c0_i32_0 = arith.constant 0 : i32
    return %arg0, %c0_i32 : i32, i32
  }
  func.func @transform_7(%arg0: i32) -> (i32, i32) {
    %c0_i32 = arith.constant 0 : i32
    %c0_i32_0 = arith.constant 0 : i32
    return %arg0, %c0_i32 : i32, i32
  }
}

</mosaic_0001>

<bundles_post_ra>
// kernel: tpu_custom_call.1
= control target key start
LH: loop header
LB: loop body
LE: loop exit
PB: predicated region body
PF: predicated region fallthrough
CT: control target
= control target key end

     0   :  { %s1806_s0 = inlined_call_operand.vmem [shape: f32[300,32], index: 0, kind: input, shape index: {}]   ;;  %s1807_s1 = inlined_call_operand.vmem [shape: f32[300,3], index: 1, kind: input, shape index: {}]   ;;  %s1808_s2 = inlined_call_operand.vmem [shape: f32[32,64], index: 2, kind: input, shape index: {}]   ;;  %s1809_s3 = inlined_call_operand.vmem [shape: f32[1,64], index: 3, kind: input, shape index: {}]   ;;  %s1810_s4 = inlined_call_operand.vmem [shape: f32[64,140], index: 4, kind: input, shape index: {}]   ;;  %s1811_s5 = inlined_call_operand.vmem [shape: f32[1,140], index: 5, kind: input, shape index: {}]   ;;  %s1812_s6 = inlined_call_operand.hbm [shape: f32[300,128], index: 6, kind: output, shape index: {0}]   ;;  %s1813_s7 = inlined_call_operand.vmem [shape: f32[300,12], index: 7, kind: output, shape index: {1}]  }
   0x1   :  { %1814 = sst [smem:[#allocation6_spill]] %s1806_s0 }
   0x2   :  { %13 = vsyncpa [#allocation3], 0 }
   0x3   :  { %15 = vsyncpa [#allocation3 + $0x1], 0  ;;  %s1453_s24 = smov 0   ;;  %s1455_s25 = smov 0  }
   0x4   :  { %s1457_s26 = smov 0   ;;  %s1459_s27 = smov 0  }
   0x5 LB: > { %s1474_s28 = sadd.s32 4294967295, %s1370_s27   ;;  %s1052_s29 = sadd.s32 4294967294, %s1370_s27   ;;  %s1370_s27 = sphi %s1459_s27, %s1824_s27   ;;  %s1366_s26 = sphi %s1457_s26, %s1823_s26   ;;  %s1362_s25 = sphi %s1455_s25, %s1822_s25   ;;  %s1358_s24 = sphi %s1453_s24, %s1821_s24  }
   0x6   : > { %s1478_s30 = sadd.s32 1, %s1370_s27   ;;  %s164_s8 = sadd.s32 1, %s1366_s26 }
   0x7   : > { %s161_s9 = ssub.s32 %s1370_s27, %s1478_s30  ;;  %p174_p0 = scmp.ne.s32.totalorder %s1366_s26, %s1362_s25 }
   0x8   : > { %p162_p1 = scmp.eq.s32.totalorder %s161_s9, 0  ;;  %p175_p2 = scmp.eq.s32.totalorder %s1474_s28, 7 }
   0x9   : > { %p180_p3 = scmp.ne.s32.totalorder %s1362_s25, %s1358_s24  ;;  %p181_p4 = scmp.eq.s32.totalorder %s1052_s29, 7 }
   0xa   : > { %s1489_s10 = scalar_select %p162_p1, %s1366_s26, %s164_s8  }
   0xb   : > { %p1491_p5 = por %p175_p2, %p174_p0  ;;  %p1495_p6 = por %p181_p4, %p180_p3 }
   0xc   : > { %p1055_p7 = scmp.ge.s32.totalorder %s1370_s27, 1  ;;  %p271_p8 = scmp.lt.s32.totalorder %s1370_s27, 9 }
   0xe   : > { %p272_p9 = pnand %p1055_p7, %p271_p8 }
   0xf   : > { %v363_v0 = vld [vmem:[%s1808_s2] sm:$0xff] (!%p272_p9)  ;;  %v364_v1 = vld [vmem:[%s1808_s2 + $0x8] sm:$0xff] (!%p272_p9)  ;;  %v365_v2 = vld [vmem:[%s1808_s2 + $0x10] sm:$0xff] (!%p272_p9)  ;;  %v1404_v3 = vmov (!%p272_p9), 0.0|0.0   ;;  %vm1405_vm0 = vmmov (!%p272_p9), 0   ;;  %v1406_v6 = vmov (!%p272_p9), 0.0  }
  0x10   : > { %275 = sbr.rel (%p272_p9) target bundleno = 588 (0x24c), region = 44  ;;  %1120 = vmatprep.subr.bf16.mxu0 (!%p272_p9), %v1404_v3  ;;  %v1121_v4 = vpack.c.bf16 (!%p272_p9), %v364_v1, %v363_v0  ;;  %v366_v5 = vld [vmem:[%s1808_s2 + $0x18] sm:$0xff] (!%p272_p9)  ;;  %1105 = vmatprep.mubr.msk.f32.mxu0 (!%p272_p9), %vm1405_vm0, %v1406_v6  ;;  %v496_v7 = vld [vmem:[%s1810_s4 + $0x8] sm:$0xff] (!%p272_p9)  ;;  %v495_v10 = vld [vmem:[%s1810_s4] sm:$0xff] (!%p272_p9)  ;;  %vm374_vm1 = vcmask (!%p272_p9), 261120   ;;  %s1817_s0 = sld [smem:[#allocation6_spill]] (!%p272_p9) }
  0x11   : > { %s1516_s21 = smul.u32 (!%p272_p9), 5, %s1474_s28  ;;  %v498_v8 = vld [vmem:[%s1810_s4 + $0x18] sm:$0xff] (!%p272_p9)  ;;  %v497_v11 = vld [vmem:[%s1810_s4 + $0x10] sm:$0xff] (!%p272_p9)  ;;  %v500_v12 = vld [vmem:[%s1810_s4 + $0x28] sm:$0xff] (!%p272_p9)  ;;  %609 = vmatprep.mubr.f32.mxu1 (!%p272_p9), %v1406_v6  ;;  %v1124_v13 = vpack.c.bf16 (!%p272_p9), %v366_v5, %v365_v2  ;;  %s1407_s9 = smov (!%p272_p9), 3   ;;  %vm523_vm3 = vcmask (!%p272_p9), 523264   ;;  %v513_v5 = vlaneseq (!%p272_p9) }
  0x12   : > { %v1126_v9 = vpack.c.bf16 (!%p272_p9), %v498_v8, %v496_v7  ;;  %1122 = vmatpush3.bf16.msra.mxu0 (!%p272_p9), %v1121_v4  ;;  %v1128_v14 = vpack.c.bf16 (!%p272_p9), %v497_v11, %v495_v10  ;;  %v502_v15 = vld [vmem:[%s1810_s4 + $0x38] sm:$0xff] (!%p272_p9)  ;;  %v499_v17 = vld [vmem:[%s1810_s4 + $0x20] sm:$0xff] (!%p272_p9)  ;;  %v501_v18 = vld [vmem:[%s1810_s4 + $0x30] sm:$0xff] (!%p272_p9)  ;;  %s311_s15 = sand.u32 (!%p272_p9), 1, %s1362_s25   ;;  %vm709_vm9 = vcmask (!%p272_p9), 23552   ;;  %vm715_vm11 = vcmask (!%p272_p9), 48128  }
  0x13   : > { %p325_p10 = scmp.lt.s32.totalorder (!%p272_p9), %s1516_s21, 37  ;;  %1123 = vmatprep.subr.bf16.mxu0 (!%p272_p9), %v1404_v3  ;;  %v1130_v16 = vpack.c.bf16 (!%p272_p9), %v502_v15, %v500_v12  ;;  %v504_v19 = vld [vmem:[%s1810_s4 + $0x48] sm:$0xff] (!%p272_p9)  ;;  %v506_v20 = vld [vmem:[%s1810_s4 + $0x58] sm:$0xff] (!%p272_p9)  ;;  %v1132_v21 = vpack.c.bf16 (!%p272_p9), %v501_v18, %v499_v17  ;;  %v503_v23 = vld [vmem:[%s1810_s4 + $0x40] sm:$0xff] (!%p272_p9)  ;;  %s1646_s20 = smul.u32 (!%p272_p9), 40, %s311_s15  ;;  %vm721_vm13 = vcmask (!%p272_p9), 72704  }
  0x14   : > { %1142 = vmatprep.subr.bf16.mxu1 (!%p272_p9), %v1126_v9  ;;  %v1134_v22 = vpack.c.bf16 (!%p272_p9), %v506_v20, %v504_v19  ;;  %v505_v24 = vld [vmem:[%s1810_s4 + $0x50] sm:$0xff] (!%p272_p9)  ;;  %v508_v31 = vld [vmem:[%s1810_s4 + $0x68] sm:$0xff] (!%p272_p9)  ;;  %v510_v32 = vld [vmem:[%s1810_s4 + $0x78] sm:$0xff] (!%p272_p9)  ;;  %vm742_vm15 = vcmask (!%p272_p9), 97280   ;;  %s1699_s23 = scalar_lea.sflag (!%p272_p9), [#allocation3], %s311_s15 }
  0x15   : > { %1146 = vmatpush1.bf16.msra.mxu1 (!%p272_p9), %v1128_v14  ;;  %v1136_v27 = vpack.c.bf16 (!%p272_p9), %v505_v24, %v503_v23  ;;  %v1138_v33 = vpack.c.bf16 (!%p272_p9), %v510_v32, %v508_v31  ;;  %v507_v34 = vld [vmem:[%s1810_s4 + $0x60] sm:$0xff] (!%p272_p9)  ;;  %v509_v35 = vld [vmem:[%s1810_s4 + $0x70] sm:$0xff] (!%p272_p9)  ;;  %s1650_s22 = scalar_lea.vmem (!%p272_p9), [#allocation2], %s1646_s20 }
  0x16   : > { %1143 = vmatprep.subr.bf16.mxu1 (!%p272_p9), %v1130_v16  ;;  %1125 = vmatpush3.bf16.msra.mxu0 (!%p272_p9), %v1124_v13  ;;  %v1140_v36 = vpack.c.bf16 (!%p272_p9), %v509_v35, %v507_v34  ;;  %v1058_v42 = vld [vmem:[%s1809_s3] ss:$0 sm:$0xff] (!%p272_p9) }
  0x17   : > { %s1545_s8 = scalar_select %p325_p10, %s1516_s21, 37  ;;  %1127 = vmatprep.subr.bf16.mxu0 %v1126_v9  ;;  %v514_v9 = vshrl.u32 %v513_v5, 7  ;;  %v511_v12 = vld [vmem:[%s1811_s5] sm:$0x3] }
  0x19   : > { %s1056_s16 = sshll.u32 %s1545_s8, 3  ;;  %1147 = vmatpush1.bf16.msra.mxu1 %v1132_v21  ;;  %s1408_s8 = smov 6   ;;  %v515_v11 = vsub.s32 0, %v514_v9  ;;  %v519_v13 = vsub.s32 1, %v514_v9 }
  0x1a   : > { %s328_s19 = scalar_lea.vmem %s1817_s0, %s1056_s16  ;;  %1144 = vmatprep.subr.bf16.mxu1 %v1134_v22  ;;  %s342_s29 = scalar_lea.vmem %s1807_s1, %s1056_s16 }
  0x1b   : > { %v358_v25 = vld [vmem:[%s328_s19] sm:$0xff]  ;;  %v359_v26 = vld [vmem:[%s328_s19 + $0x8] sm:$0xff]  ;;  %v360_v28 = vld [vmem:[%s328_s19 + $0x10] sm:$0xff]  ;;  %s1409_s16 = smov 9   ;;  %v1642_v15 = vrot.slane %v511_v12, %v519_v13 }
  0x1c   : > { %1106 = vmatmul.mubr.msk.f32.vlgmr.msra.gmra.mrb[0].mxu0 %vm374_vm1, %v358_v25  ;;  %v361_v29 = vld [vmem:[%s328_s19 + $0x18] sm:$0xff]  ;;  %v362_v30 = vld [vmem:[%s328_s19 + $0x20] sm:$0xff]  ;;  %v1598_v38 = vld [vmem:[%s342_s29 + $0x10] sm:$0xff]  ;;  %s1671_s19 = scalar_lea.vmem [#allocation4], %s1646_s20  }
  0x1d   : > { %1108 = vmatprep.mubr.msk.f32.mxu0 %vm1405_vm0, %v1406_v6  ;;  %1129 = vmatpush1.bf16.msra.mxu0 %v1128_v14  ;;  %v1596_v37 = vld [vmem:[%s342_s29] sm:$0xff]  ;;  %v1602_v39 = vld [vmem:[%s342_s29 + $0x8] sm:$0xff]  ;;  %v1604_v40 = vld [vmem:[%s342_s29 + $0x18] sm:$0xff]  ;;  %v516_v14 = vrot.slane %v511_v12, %v515_v11 }
  0x1e   : > { %1131 = vmatprep.subr.bf16.mxu0 %v1130_v16  ;;  %1148 = vmatpush1.bf16.msra.mxu1 %v1136_v27  ;;  %v1608_v41 = vld [vmem:[%s342_s29 + $0x20] sm:$0xff]  ;;  %s761_s29 = ssub.s32 (%p1491_p5), 38, %s1516_s21 }
  0x1f   : > { %1145 = vmatprep.subr.bf16.mxu1 %v1138_v33  ;;  %664 = vrot.lane.b32.xlu0 %v1596_v37, %s1407_s9  ;;  %p762_p11 = scmp.lt.s32.totalorder (%p1491_p5), %s761_s29, 5 }
  0x20   : > { %1109 = vmatmul.mubr.msk.f32.gmra.mrb[2].mxu0 %vm374_vm1, %v359_v26  ;;  %668 = vrot.lane.b32.xlu1 %v1598_v38, %s1407_s9 }
  0x21   : > { %1111 = vmatprep.mubr.msk.f32.mxu0 %vm1405_vm0, %v1406_v6  ;;  %1133 = vmatpush1.bf16.msra.mxu0 %v1132_v21 }
  0x22   : > { %1135 = vmatprep.subr.bf16.mxu0 %v1134_v22  ;;  %1149 = vmatpush1.bf16.msra.mxu1 %v1140_v36 }
  0x23   : > { %666 = vrot.lane.b32.xlu0 %v1602_v39, %s1407_s9 }
  0x24   : > { %1112 = vmatmul.mubr.msk.f32.gmra.mrb[4].mxu0 %vm374_vm1, %v360_v28  ;;  %670 = vrot.lane.b32.xlu1 %v1604_v40, %s1407_s9 }
  0x25   : > { %1114 = vmatprep.mubr.msk.f32.mxu0 %vm1405_vm0, %v1406_v6  ;;  %1137 = vmatpush1.bf16.msra.mxu0 %v1136_v27 }
  0x26   : > { %1139 = vmatprep.subr.bf16.mxu0 %v1138_v33 }
  0x27   : > { %672 = vrot.lane.b32.xlu0 %v1608_v41, %s1407_s9 }
  0x28   : > { %1115 = vmatmul.mubr.msk.f32.gmra.mrb[6].mxu0 %vm374_vm1, %v361_v29  ;;  %679 = vrot.lane.b32.xlu1 %v1596_v37, %s1408_s8 }
  0x29   : > { %1117 = vmatprep.mubr.msk.f32.mxu0 %vm1405_vm0, %v1406_v6  ;;  %1141 = vmatpush1.bf16.msra.mxu0 %v1140_v36 }
  0x2b   : > { %681 = vrot.lane.b32.xlu0 %v1602_v39, %s1408_s8 }
  0x2c   : > { %1118 = vmatmul.mubr.msk.f32.gmra.mrb[8].mxu0 %vm374_vm1, %v362_v30  ;;  %683 = vrot.lane.b32.xlu1 %v1598_v38, %s1408_s8 }
  0x2d   : > { %603 = vmatprep.mubr.f32.mxu0 %v1406_v6 }
  0x2f   : > { %685 = vrot.lane.b32.xlu0 %v1604_v40, %s1408_s8 }
  0x30   : > { %687 = vrot.lane.b32.xlu1 %v1608_v41, %s1408_s8 }
  0x33   : > { %694 = vrot.lane.b32.xlu0 %v1596_v37, %s1409_s16 }
  0x34   : > { %696 = vrot.lane.b32.xlu1 %v1602_v39, %s1409_s16 }
  0x37   : > { %698 = vrot.lane.b32.xlu0 %v1598_v38, %s1409_s16 }
  0x38   : > { %700 = vrot.lane.b32.xlu1 %v1604_v40, %s1409_s16 }
  0x3b   : > { %702 = vrot.lane.b32.xlu0 %v1608_v41, %s1409_s16 }
  0x91   : > { %v665_v4 = vpop.permute.xlu0 %664 }
  0x92   : > { %v1633_v7 = vpop.permute.xlu1 %668  ;;  %v710_v35 = vsel %vm709_vm9, %v1596_v37, %v665_v4 }
  0x95   : > { %v667_v8 = vpop.permute.xlu0 %666 }
  0x96   : > { %v1635_v10 = vpop.permute.xlu1 %670  ;;  %v711_v37 = vsel %vm709_vm9, %v1602_v39, %v667_v8 }
  0x97   : > { %v713_v8 = vsel %vm709_vm9, %v1604_v40, %v1635_v10 }
  0x9a   : > { %v680_v16 = vpop.permute.xlu1 %679 }
  0x9e   : > { %v684_v25 = vpop.permute.xlu1 %683 }
  0xef   : > { %v456_v43 = vpop.f32.mrb[0].mxu0 }
  0xf0   : > { %v457_v44 = vadd.f32 %v1058_v42, %v456_v43  ;;  %v1107_v45 = vpop.f32.mrb[1].mxu0 }
  0xf1   : > { %v716_v45 = vsel %vm715_vm11, %v710_v35, %v680_v16 }
  0xf2   : > { %vm480_vm2 = vcmp.gt.f32.partialorder %v457_v44, 0.0  ;;  %v485_v46 = vmul.f32 0.01, %v457_v44 }
  0xf3   : > { %v461_v47 = vpop.f32.mrb[2].mxu0 }
  0xf4   : > { %v490_v48 = vsel %vm480_vm2, %v457_v44, %v485_v46  ;;  %v462_v49 = vadd.f32 %v1058_v42, %v461_v47  ;;  %v1110_v50 = vpop.f32.mrb[3].mxu0 }
  0xf5   : > { %1064 = vmatmul.mubr.msk.f32.vlgmr.msra.gmra.mrb[10].mxu0 %vm523_vm3, %v490_v48 }
  0xf6   : > { %vm481_vm4 = vcmp.gt.f32.partialorder %v462_v49, 0.0  ;;  %v486_v51 = vmul.f32 0.01, %v462_v49 }
  0xf7   : > { %v466_v52 = vpop.f32.mrb[4].mxu0 }
  0xf8   : > { %v467_v53 = vadd.f32 %v1058_v42, %v466_v52  ;;  %v1113_v54 = vpop.f32.mrb[5].mxu0  ;;  %v491_v55 = vsel %vm481_vm4, %v462_v49, %v486_v51 }
  0xf9   : > { %1065 = vmatmul.mubr.msk.f32.vlgmr.msra.gmra.mrb[0].mxu1 %vm523_vm3, %v491_v55 }
  0xfa   : > { %vm482_vm5 = vcmp.gt.f32.partialorder %v467_v53, 0.0  ;;  %v487_v56 = vmul.f32 0.01, %v467_v53  ;;  %615 = vmatprep.mubr.f32.mxu1 %v1406_v6 }
  0xfb   : > { %v471_v57 = vpop.f32.mrb[6].mxu0 }
  0xfc   : > { %v472_v58 = vadd.f32 %v1058_v42, %v471_v57  ;;  %v1116_v59 = vpop.f32.mrb[7].mxu0  ;;  %v492_v60 = vsel %vm482_vm5, %v467_v53, %v487_v56 }
  0xfd   : > { %1066 = vmatmul.mubr.msk.f32.gmra.mrb[2].mxu1 %vm523_vm3, %v492_v60 }
  0xfe   : > { %vm483_vm6 = vcmp.gt.f32.partialorder %v472_v58, 0.0  ;;  %v488_v61 = vmul.f32 0.01, %v472_v58  ;;  %621 = vmatprep.mubr.f32.mxu1 %v1406_v6 }
  0xff   : > { %v476_v62 = vpop.f32.mrb[8].mxu0 }
 0x100   : > { %v477_v63 = vadd.f32 %v1058_v42, %v476_v62  ;;  %v1119_v0 = vpop.f32.mrb[9].mxu0  ;;  %v493_v1 = vsel %vm483_vm6, %v472_v58, %v488_v61  ;;  %v688_v42 = vpop.permute.xlu1 %687  ;;  %v712_v62 = vsel %vm709_vm9, %v1598_v38, %v1633_v7 }
 0x101   : > { %1067 = vmatmul.mubr.msk.f32.gmra.mrb[4].mxu1 %vm523_vm3, %v493_v1 }
 0x102   : > { %vm484_vm7 = vcmp.gt.f32.partialorder %v477_v63, 0.0  ;;  %v489_v2 = vmul.f32 0.01, %v477_v63  ;;  %627 = vmatprep.mubr.f32.mxu1 %v1406_v6  ;;  %v1640_v6 = vpop.permute.xlu0 %672 }
 0x103   : > { %v714_v16 = vsel %vm709_vm9, %v1608_v41, %v1640_v6 }
 0x104   : > { %v494_v3 = vsel %vm484_vm7, %v477_v63, %v489_v2  ;;  %v697_v58 = vpop.permute.xlu1 %696 }
 0x105   : > { %1068 = vmatmul.mubr.msk.f32.gmra.mrb[6].mxu1 %vm523_vm3, %v494_v3  ;;  %v718_v3 = vsel %vm715_vm11, %v712_v62, %v684_v25 }
 0x106   : > { %v682_v18 = vpop.permute.xlu0 %681 }
 0x107   : > { %v717_v56 = vsel %vm715_vm11, %v711_v37, %v682_v18 }
 0x108   : > { %v723_v2 = vsel %vm721_vm13, %v717_v56, %v697_v58 }
 0x10a   : > { %v686_v29 = vpop.permute.xlu0 %685 }
 0x10b   : > { %v719_v12 = vsel %vm715_vm11, %v713_v8, %v686_v29 }
 0x10e   : > { %v695_v46 = vpop.permute.xlu0 %694 }
 0x10f   : > { %v722_v54 = vsel %vm721_vm13, %v716_v45, %v695_v46 }
 0x112   : > { %v699_v4 = vpop.permute.xlu0 %698 }
 0x113   : > { %v724_v11 = vsel %vm721_vm13, %v718_v3, %v699_v4 }
 0x116   : > { %v703_v18 = vpop.permute.xlu0 %702 }
 0x1c8   : > { %v605_v17 = vpop.f32.mrb[10].mxu0 }
 0x1c9   : > { %v606_v19 = vadd.f32 %v605_v17, %v516_v14  ;;  %v607_v20 = vpop.f32.mrb[11].mxu0  ;;  %v720_v17 = vsel %vm715_vm11, %v714_v16, %v688_v42 }
 0x1ca   : > { %v608_v21 = vadd.f32 %v607_v20, %v1642_v15 }
 0x1cb   : > { %vm634_vm8 = vcmp.gt.f32.partialorder %v606_v19, 0.0  ;;  %v639_v22 = vmul.f32 0.01, %v606_v19 }
 0x1cc   : > { %1262 = vtanh.f32 %v608_v21  ;;  %v611_v23 = vpop.f32.mrb[0].mxu1 }
 0x1cd   : > { %v644_v24 = vsel %vm634_vm8, %v606_v19, %v639_v22  ;;  %v612_v26 = vadd.f32 %v611_v23, %v516_v14  ;;  %v613_v27 = vpop.f32.mrb[1].mxu1  ;;  %v726_v22 = vsel %vm721_vm13, %v720_v17, %v703_v18 }
 0x1ce   : > { %649 = vst [vmem:[%s1650_s22] sm:$0xff] %v644_v24  ;;  %v614_v28 = vadd.f32 %v613_v27, %v1642_v15 }
 0x1cf   : > { %vm635_vm10 = vcmp.gt.f32.partialorder %v612_v26, 0.0  ;;  %v640_v30 = vmul.f32 0.01, %v612_v26 }
 0x1d0   : > { %1264 = vtanh.f32 %v614_v28  ;;  %v617_v31 = vpop.f32.mrb[2].mxu1 }
 0x1d1   : > { %v645_v32 = vsel %vm635_vm10, %v612_v26, %v640_v30  ;;  %v618_v33 = vadd.f32 %v617_v31, %v516_v14  ;;  %v619_v34 = vpop.f32.mrb[3].mxu1 }
 0x1d2   : > { %650 = vst [vmem:[%s1650_s22 + $0x8] sm:$0xff] %v645_v32  ;;  %v620_v36 = vadd.f32 %v619_v34, %v1642_v15 }
 0x1d3   : > { %vm636_vm12 = vcmp.gt.f32.partialorder %v618_v33, 0.0  ;;  %v641_v43 = vmul.f32 0.01, %v618_v33 }
 0x1d4   : > { %1266 = vtanh.f32 %v620_v36  ;;  %v623_v44 = vpop.f32.mrb[4].mxu1 }
 0x1d5   : > { %v646_v47 = vsel %vm636_vm12, %v618_v33, %v641_v43  ;;  %v624_v48 = vadd.f32 %v623_v44, %v516_v14  ;;  %v625_v49 = vpop.f32.mrb[5].mxu1 }
 0x1d6   : > { %v1263_v50 = vpop.eup %1262  ;;  %651 = vst [vmem:[%s1650_s22 + $0x10] sm:$0xff] %v646_v47  ;;  %v626_v51 = vadd.f32 %v625_v49, %v1642_v15 }
 0x1d7   : > { %v732_v52 = vmul.f32 0.5, %v1263_v50  ;;  %vm637_vm14 = vcmp.gt.f32.partialorder %v624_v48, 0.0  ;;  %v642_v53 = vmul.f32 0.01, %v624_v48 }
 0x1d8   : > { %1268 = vtanh.f32 %v626_v51  ;;  %v629_v55 = vpop.f32.mrb[6].mxu1 }
 0x1d9   : > { %v737_v57 = vadd.f32 %v732_v52, %v722_v54  ;;  %v647_v59 = vsel %vm637_vm14, %v624_v48, %v642_v53  ;;  %v630_v60 = vadd.f32 %v629_v55, %v516_v14  ;;  %v631_v39 = vpop.f32.mrb[7].mxu1  ;;  %v701_v14 = vpop.permute.xlu1 %700 }
 0x1da   : > { %v1265_v61 = vpop.eup %1264  ;;  %652 = vst [vmem:[%s1650_s22 + $0x18] sm:$0xff] %v647_v59  ;;  %v632_v63 = vadd.f32 %v631_v39, %v1642_v15  ;;  %v725_v10 = vsel %vm721_vm13, %v719_v12, %v701_v14 }
 0x1db   : > { %743 = vst.msk [vmem:[%s1671_s19] sm:$0xff] %vm742_vm15, %v737_v57  ;;  %v733_v0 = vmul.f32 0.5, %v1265_v61  ;;  %vm638_vm0 = vcmp.gt.f32.partialorder %v630_v60, 0.0  ;;  %v643_v1 = vmul.f32 0.01, %v630_v60 }
 0x1dc   : > { %1270 = vtanh.f32 %v632_v63 }
 0x1dd   : > { %v738_v38 = vadd.f32 %v733_v0, %v723_v2  ;;  %v648_v5 = vsel %vm638_vm0, %v630_v60, %v643_v1 }
 0x1de   : > { %v1267_v7 = vpop.eup %1266  ;;  %653 = vst [vmem:[%s1650_s22 + $0x20] sm:$0xff] %v648_v5 }
 0x1df   : > { %744 = vst.msk [vmem:[%s1671_s19 + $0x8] sm:$0xff] %vm742_vm15, %v738_v38  ;;  %v734_v9 = vmul.f32 0.5, %v1267_v7 }
 0x1e1   : > { %v739_v13 = vadd.f32 %v734_v9, %v724_v11 }
 0x1e2   : > { %v1269_v15 = vpop.eup %1268 }
 0x1e3   : > { %745 = vst.msk [vmem:[%s1671_s19 + $0x10] sm:$0xff] %vm742_vm15, %v739_v13  ;;  %v735_v40 = vmul.f32 0.5, %v1269_v15 }
 0x1e5   : > { %v740_v19 = vadd.f32 %v735_v40, %v725_v10  ;;  %759 = sbr.rel (!%p1491_p5) target bundleno = 520 (0x208), region = 48 }
 0x1e6   : > { %v1271_v20 = vpop.eup %1270 }
 0x1e7   : > { %746 = vst.msk [vmem:[%s1671_s19 + $0x18] sm:$0xff] %vm742_vm15, %v740_v19  ;;  %v736_v21 = vmul.f32 0.5, %v1271_v20 }
 0x1e9   : > { %v741_v23 = vadd.f32 %v736_v21, %v726_v22 }
 0x1eb   : > { %747 = vst.msk [vmem:[%s1671_s19 + $0x20] sm:$0xff] %vm742_vm15, %v741_v23 }
 0x1ec   : > { %s1826_s29 = smov (!%p762_p11, %s761_s29), 5 }
 0x1ed   : > { %s1704_s9 = sshll.u32 %s1826_s29, 7 }
 0x1ee   : > { %s766_s8 = ssub.s32 640, %s1704_s9 }
 0x1ef   : > { %767 = vsyncadd %s1699_s23, %s766_s8  ;;  %p1070_p12 = scmp.ne.s32.totalorder %s1704_s9, 0  ;;  %s1086_s16 = smul.u32 640, %s1474_s28 }
 0x1f0   : > { %s772_s13 = sshll.u32 %s1650_s22, 4  ;;  %s1410_s20 = smov [#allocation2]   ;;  %s1716_s13 = int_to_ptr.vmem [resolvable:$true] %s772_s13 }
 0x1f1   : > { %s1714_s17 = scalar_lea.hbm %s1812_s6, %s1086_s16  ;;  %s1276_s18 = scalar_lea.vmem %s1716_s13, %s1704_s9 }
 0x1f2   : > { %p1277_p13 = scmp.ne.s32.totalorder %s1716_s13, %s1276_s18  ;;  %s1280_s29 = sshll.u32 %s1410_s20, 4  ;;  %s1281_s29 = int_to_ptr.vmem [resolvable:$false] %s1280_s29 }
 0x1f3   : > { %s1282_s8 = scalar_lea.vmem %s1281_s29, 1280  ;;  %p1283_p2 = scmp.lt.s32.totalorder %s1716_s13, %s1281_s29 }
 0x1f4   : > { %p1278_p0 = pnand %p1277_p13, %p1070_p12  ;;  %p1284_p3 = scmp.lt.s32.totalorder %s1282_s8, %s1276_s18 }
 0x1f6   : > { %p1279_p1 = pneg %p1278_p0  ;;  %p1285_p4 = por %p1284_p3, %p1283_p2 }
 0x1f8   : > { %p1286_p7 = pnand %p1285_p4, %p1279_p1 }
 0x1fa   : > { %1289 = shalt.err (!%p1286_p7)
}
 0x1fb   : > { %s1290_s22 = scalar_lea.hbm %s1714_s17, %s1704_s9  ;;  %s1294_s15 = scalar_lea.hbm %s1812_s6, 4864 }
 0x1fc   : > { %p1291_p8 = scmp.ne.s32.totalorder %s1714_s17, %s1290_s22  ;;  %p1295_p11 = scmp.lt.u32.totalorder %s1714_s17, %s1812_s6 }
 0x1fd   : > { %p1296_p13 = scmp.lt.u32.totalorder %s1294_s15, %s1290_s22  ;;  %p1298_p1 = scmp.lt.u32.totalorder %s1290_s22, %s1714_s17 }
 0x1fe   : > { %p1292_p9 = pnand %p1291_p8, %p1070_p12 }
 0x1ff   : > { %p1297_p0 = por %p1296_p13, %p1295_p11 }
 0x200   : > { %p1293_p10 = pneg %p1292_p9 }
 0x201   : > { %p1299_p2 = por %p1298_p1, %p1297_p0 }
 0x203   : > { %p1300_p3 = pnand %p1299_p2, %p1293_p10 }
 0x205   : > { %1303 = shalt.err (!%p1300_p3)
}
 0x206   : > { %s1411_s29 = smov 128   ;;  %s1412_s8 = smov 8  }
 0x207   : > { %778 = dma.vmem_to_hbm [thread:$0]  (%p1070_p12), %s1716_s13, %s1704_s9, %s1714_s17, %s1699_s23, %s1411_s29, %s1411_s29, %s1412_s8  }
 0x208 PF: > { %781 = sbr.rel (!%p1491_p5) target bundleno = 588 (0x24c), region = 52  ;;  %s783_s16 = ssub.s32 (%p1491_p5), 38, %s1516_s21 }
 0x209   : > { %s1087_s22 = smul.u32 (%p1491_p5), 40, %s1474_s28  ;;  %p784_p4 = scmp.lt.s32.totalorder (%p1491_p5), %s783_s16, 5 }
 0x20b   : > { %s1750_s20 = scalar_lea.vmem (%p1491_p5), %s1813_s7, %s1087_s22  }
 0x20f   : > { %s1828_s16 = smov (!%p784_p4, %s783_s16), 5 }
 0x210   : > { %s1074_s18 = sshll.u32 %s1828_s16, 7 }
 0x211   : > { %p1077_p7 = scmp.eq.s32.totalorder %s1074_s18, 0 }
 0x212   : > { %1272 = sdivrem.u32 (!%p1077_p7), %s1828_s16, 5 }
 0x213   : > { %792 = sbr.rel (%p1077_p7) target bundleno = 588 (0x24c), region = 56 }
 0x21b   : > { %s1756_s11 = spop.drf %1272 }
 0x21c   : > { %p1078_p5 = scmp.le.s32.totalorder %s1756_s11, 0 }
 0x21d   : > { %s1818_s28 = smov (!%p1078_p5), %s1750_s20  ;;  %s1819_s21 = smov (!%p1078_p5), %s1671_s19 }
 0x21e   : > { %993 = sbr.rel (%p1078_p5) target bundleno = 559 (0x22f), region = 148  ;;  %s1765_s23 = smov (!%p1078_p5), 0  }
 0x21f   : > { %s1767_s9 = smov (!%p1078_p5), 0  }
 0x225 LB: >> { %v864_v41 = vld [vmem:[%s1378_s21] sm:$0xff]  ;;  %v866_v6 = vld [vmem:[%s1378_s21 + $0x8] sm:$0xff]  ;;  %v868_v24 = vld [vmem:[%s1378_s21 + $0x10] sm:$0xff]  ;;  %s874_s13 = sadd.s32 1, %s1382_s23  ;;  %s858_s9 = sadd.s32 1, %s1386_s9   ;;  %s1386_s9 = sphi %s1767_s9, %s858_s9   ;;  %s1382_s23 = sphi %s1765_s23, %s1820_s23   ;;  %s1378_s21 = sphi %s1819_s21, %s879_s21   ;;  %s1374_s28 = sphi %s1818_s28, %s880_s28  }
 0x226   : >> { %865 = vst [vmem:[%s1374_s28] sm:$0xff] %v864_v41  ;;  %867 = vst [vmem:[%s1374_s28 + $0x8] sm:$0xff] %v866_v6  ;;  %v870_v25 = vld [vmem:[%s1378_s21 + $0x18] sm:$0xff]  ;;  %v872_v26 = vld [vmem:[%s1378_s21 + $0x20] sm:$0xff]  ;;  %p875_p12 = scmp.ge.s32.totalorder %s874_s13, %s1756_s11  ;;  %p857_p8 = scmp.ge.s32.totalorder %s858_s9, %s1756_s11 }
 0x227   : >> { %869 = vst [vmem:[%s1374_s28 + $0x10] sm:$0xff] %v868_v24  ;;  %871 = vst [vmem:[%s1374_s28 + $0x18] sm:$0xff] %v870_v25 }
 0x228   : >> { %873 = vst [vmem:[%s1374_s28 + $0x20] sm:$0xff] %v872_v26  ;;  %s1830_s13 = smov (%p875_p12, %s874_s13), 0  ;;  %860 = sbr.rel (!%p857_p8) target bundleno = 549 (0x225), region = 154 }
 0x229   : >> { %s877_s17 = smul.u32 40, %s1830_s13  ;;  %s1820_s23 = smov %s1830_s13 }
 0x22b   : >> { %s879_s21 = scalar_lea.vmem %s1671_s19, %s877_s17 [#allocation4]   ;;  %s880_s28 = scalar_lea.vmem %s1750_s20, %s877_s17  }
 0x22f PF: > { %1274 = sdivrem.u32 %s1828_s16, 5 }
 0x230   : > { %s1079_s29 = smul.u32 40, %s1756_s11 }
 0x232   : > { %s885_s8 = scalar_lea.vmem %s1671_s19, %s1079_s29 [#allocation4]   ;;  %s887_s22 = scalar_lea.vmem %s1750_s20, %s1079_s29  }
 0x238   : > { %s1275_s14 = spop.drf %1274 }
 0x239   : > { %p1081_p9 = scmp.le.s32.totalorder %s1275_s14, 0 }
 0x23a   : > { %s1388_s15 = smov (!%p1081_p9), %s887_s22   ;;  %s1392_s18 = smov (!%p1081_p9), %s885_s8  }
 0x23b   : > { %1007 = sbr.rel (%p1081_p9) target bundleno = 588 (0x24c), region = 159  ;;  %s1396_s17 = smov (!%p1081_p9), 0  }
 0x23c   : > { %s1400_s0 = smov (!%p1081_p9), 0  }
 0x242 LB: >> { %v897_v27 = vld [vmem:[%s1394_s18] sm:$0xff]  ;;  %s899_s28 = sadd.s32 1, %s1398_s17  ;;  %s891_s0 = sadd.s32 1, %s1402_s0   ;;  %s1402_s0 = sphi %s1400_s0, %s891_s0   ;;  %s1398_s17 = sphi %s1396_s17, %s1397_s17   ;;  %s1394_s18 = sphi %s1392_s18, %s904_s18   ;;  %s1390_s15 = sphi %s1388_s15, %s905_s15  }
 0x243   : >> { %898 = vst [vmem:[%s1390_s15] sm:$0xff] %v897_v27  ;;  %p900_p10 = scmp.ge.s32.totalorder %s899_s28, %s1275_s14  ;;  %p890_p11 = scmp.ge.s32.totalorder %s891_s0, %s1275_s14 }
 0x245   : >> { %s1832_s28 = smov (%p900_p10, %s899_s28), 0  ;;  %893 = sbr.rel (!%p890_p11) target bundleno = 578 (0x242), region = 165 }
 0x246   : >> { %s1082_s19 = sshll.u32 %s1832_s28, 3  ;;  %s1397_s17 = smov %s1832_s28  }
 0x247   : >> { %s904_s18 = scalar_lea.vmem %s885_s8, %s1082_s19 [#allocation4]   ;;  %s905_s15 = scalar_lea.vmem %s887_s22, %s1082_s19  }
 0x24c PF: > { %p1156_p13 = scmp.ge.s32.totalorder %s1370_s27, 2  ;;  %s917_s16 = sand.u32 1, %s1358_s24  }
 0x24d   : > { %s918_s20 = scalar_lea.sflag [#allocation3], %s917_s16 }
 0x24e   : > { %p1153_p0 = pnand %p1156_p13, %p1495_p6 }
 0x250   : > { %1353 = dma.done.wait (!%p1153_p0), %s918_s20, 640  }
 0x251   : > { %1355 = vsyncadd (!%p1153_p0), %s918_s20, 4294966656  ;;  %p18_p1 = scmp.ge.s32.totalorder %s1478_s30, 10   ;;  %s1821_s24 = smov %s1362_s25 }
 0x252   : > { %s1822_s25 = smov %s1366_s26  ;;  %s1823_s26 = smov %s1489_s10 }
 0x253   : > { %s1824_s27 = smov %s1478_s30  ;;  %20 = sbr.rel (!%p18_p1) target bundleno = 5 (0x5), region = 176 }
 0x25a   :  { %930 = vsyncpa [#allocation3], 1 }
 0x25b   :  { %932 = vsyncpa [#allocation3 + $0x1], 1 }

</bundles_post_ra>
